<compile_context>
chip_gen: v6e
topology: v6e:2x2x1
jax: 0.10.0
libtpu: 0.0.40
codegen_flags: <defaults>
</compile_context>

<pallas_src>
import jax
import jax.numpy as jnp
from jax.experimental import pallas as pl
from jax.experimental.pallas import tpu as pltpu

_TARGET_BLOCK_BYTES = 2 * 1024 * 1024  # ~2 MiB x-block: >=85% HBM roofline, v7x-safe


def _pick_tile(dim, target, multiple):
    """Largest tile <= target that is a multiple of `multiple` and divides dim,
    falling back to the full dim (full-dim blocks are always legal)."""
    if dim <= target:
        return dim
    cand = (target // multiple) * multiple
    while cand >= multiple:
        if dim % cand == 0:
            return cand
        cand -= multiple
    return dim


def _style_linear_kernel(lat_ref, wt_ref, b_ref, o_ref):
    # lat: (N, L) f32; wt: (L, 2C) f32 (pre-transposed, w_mul folded);
    # b: (1, 2C) f32 (b_mul folded); o: (N, 2C) f32
    o_ref[...] = (
        jnp.dot(lat_ref[...], wt_ref[...], preferred_element_type=jnp.float32)
        + b_ref[...]
    ).astype(o_ref.dtype)


def _stylemod_kernel(scale_ref, shift_ref, x_ref, o_ref):
    # scale/shift: (TC, 1) f32 ; x/o: (TC, THW)
    x = x_ref[...].astype(jnp.float32)
    o_ref[...] = (x * (scale_ref[...] + 1.0) + shift_ref[...]).astype(o_ref.dtype)


@jax.jit
def style_mod(x, latent, weight, bias, w_mul=1.0, b_mul=1.0):
    """x: (N, C, H, W); latent: (N, L); weight: (2C, L); bias: (2C,)."""
    N, C, H, W = x.shape
    HW = H * W
    L = latent.shape[-1]

    # ---- style = linear(latent) (tiny; single-block Pallas call) ----
    w_eff = (weight * w_mul).astype(jnp.float32).T          # (L, 2C)
    b_eff = (bias * b_mul).astype(jnp.float32).reshape(1, 2 * C)
    lat_f32 = latent.astype(jnp.float32)

    style = pl.pallas_call(
        _style_linear_kernel,
        out_shape=jax.ShapeDtypeStruct((N, 2 * C), jnp.float32),
    )(lat_f32, w_eff, b_eff)

    # PyTorch view(-1, 2, C, 1, 1): row 0 -> scale-1, row 1 -> shift.
    scale = style[:, :C].reshape(N, C, 1)   # f32, tiny
    shift = style[:, C:].reshape(N, C, 1)   # f32, tiny

    x_flat = x.reshape(N, C, HW)

    if HW < 128:
        # TODO(synk): tiny feature maps (4x4 / 8x8) are lane-starved in this layout;
        # a Pallas kernel would only pay masked-store + launch overhead, so let XLA fuse.
        out = x_flat.astype(jnp.float32) * (scale + 1.0) + shift
        return out.astype(x.dtype).reshape(N, C, H, W)

    # ---- tiled, pipelined modulation kernel ----
    itemsize = jnp.dtype(x.dtype).itemsize
    THW = _pick_tile(HW, 2048, 128)                                  # lane-dense tile
    tc_target = max(8, _TARGET_BLOCK_BYTES // max(1, THW * itemsize))
    TC = _pick_tile(C, tc_target, 8)

    blk_bytes = TC * THW * itemsize
    # x + out double-buffered (+ scale/shift + headroom); cap well under v7x's 64 MiB.
    vmem_limit = int(min(max(16 << 20, 8 * blk_bytes + (2 << 20)), 32 << 20))

    grid = (N, pl.cdiv(C, TC), pl.cdiv(HW, THW))

    out_flat = pl.pallas_call(
        _stylemod_kernel,
        out_shape=jax.ShapeDtypeStruct((N, C, HW), x.dtype),
        grid_spec=pltpu.PrefetchScalarGridSpec(
            num_scalar_prefetch=0,
            grid=grid,
            in_specs=[
                # scale / shift: hw-independent -> resident across inner hw loop.
                pl.BlockSpec((None, TC, 1), lambda b, c, hw: (b, c, 0)),
                pl.BlockSpec((None, TC, 1), lambda b, c, hw: (b, c, 0)),
                pl.BlockSpec((None, TC, THW), lambda b, c, hw: (b, c, hw)),
            ],
            out_specs=pl.BlockSpec((None, TC, THW), lambda b, c, hw: (b, c, hw)),
        ),
        compiler_params=pltpu.CompilerParams(
            dimension_semantics=("parallel", "parallel", "parallel"),
            vmem_limit_bytes=vmem_limit,
        ),
    )(scale, shift, x_flat)

    return out_flat.reshape(N, C, H, W)


if __name__ == "__main__":
    key = jax.random.PRNGKey(0)
    k_x, k_lat, k_w = jax.random.split(key, 3)

    N, C, H, W = 2, 4, 16, 16
    latent_size = 32

    # MyLinear init (gain=1.0 as in StyleMod, use_wscale=True, lrmul=1).
    gain, lrmul, use_wscale = 1.0, 1.0, True
    he_std = gain * latent_size ** (-0.5)
    if use_wscale:
        init_std = 1.0 / lrmul
        w_mul = he_std * lrmul
    else:
        init_std = he_std / lrmul
        w_mul = lrmul
    b_mul = lrmul

    weight = jax.random.normal(k_w, (2 * C, latent_size), dtype=jnp.float32) * init_std
    bias = jnp.zeros((2 * C,), dtype=jnp.float32)   # matches torch.zeros(channels*2)

    x = jax.random.normal(k_x, (N, C, H, W), dtype=jnp.float32)
    latent = jax.random.normal(k_lat, (N, latent_size), dtype=jnp.float32)

    out = style_mod(x, latent, weight, bias, w_mul, b_mul)
    jax.block_until_ready(out)

    # Pure-JAX reference of the PyTorch forward.
    style_ref = latent @ (weight * w_mul).T + bias * b_mul
    style_ref = style_ref.reshape(N, 2, C)
    ref = (x * (style_ref[:, 0].reshape(N, C, 1, 1) + 1.0)
           + style_ref[:, 1].reshape(N, C, 1, 1))

    assert out.shape == (N, C, H, W)
    # Loose tolerance: MXU f32 matmul precision may differ slightly from the XLA reference.
    assert jnp.allclose(out, ref, atol=1e-2, rtol=1e-2), float(jnp.max(jnp.abs(out - ref)))

    print("KERNEL_OK")
</pallas_src>

<mosaic_0001>
module attributes {stable_mosaic.version = 11 : i64} {
  func.func @_style_linear_kernel(%arg0: memref<2x32xf32, #tpu.memory_space<vmem>>, %arg1: memref<32x8xf32, #tpu.memory_space<vmem>>, %arg2: memref<1x8xf32, #tpu.memory_space<vmem>>, %arg3: memref<2x8xf32, #tpu.memory_space<vmem>>) attributes {dimension_semantics = [], scalar_prefetch = 0 : i64, scratch_operands = 0 : i64, tpu.core_type = #tpu.core_type<tc>} {
    %c0 = arith.constant 0 : index
    %c0_0 = arith.constant 0 : index
    %0 = vector.load %arg0[%c0, %c0_0] : memref<2x32xf32, #tpu.memory_space<vmem>>, vector<2x32xf32>
    %c0_1 = arith.constant 0 : index
    %c0_2 = arith.constant 0 : index
    %1 = vector.load %arg1[%c0_1, %c0_2] : memref<32x8xf32, #tpu.memory_space<vmem>>, vector<32x8xf32>
    %cst = arith.constant dense<0.000000e+00> : vector<2x8xf32>
    %2 = tpu.matmul %0, %1, %cst {dimension_numbers = #tpu.dot_dimension_numbers<[1], [0], [0], [1], [0, 0, 1, 1], [], []>} : vector<2x32xf32>, vector<32x8xf32>, vector<2x8xf32> -> vector<2x8xf32>
    %c0_3 = arith.constant 0 : index
    %c0_4 = arith.constant 0 : index
    %3 = vector.load %arg2[%c0_3, %c0_4] : memref<1x8xf32, #tpu.memory_space<vmem>>, vector<1x8xf32>
    %4 = vector.broadcast %3 : vector<1x8xf32> to vector<2x8xf32>
    %5 = arith.addf %2, %4 : vector<2x8xf32>
    %c0_5 = arith.constant 0 : index
    %c0_6 = arith.constant 0 : index
    %6 = vector.load %arg3[%c0_5, %c0_6] : memref<2x8xf32, #tpu.memory_space<vmem>>, vector<2x8xf32>
    tpu.vector_store %arg3[%c0_5, %c0_6], %5 {strides = array<i32>} : memref<2x8xf32, #tpu.memory_space<vmem>>, vector<2x8xf32>,
    return
  }
}

module attributes {stable_mosaic.version = 11 : i64} {
  func.func @_stylemod_kernel(%arg0: i32, %arg1: i32, %arg2: i32, %arg3: memref<1x4x1xf32, #tpu.memory_space<vmem>>, %arg4: memref<1x4x1xf32, #tpu.memory_space<vmem>>, %arg5: memref<1x4x256xf32, #tpu.memory_space<vmem>>, %arg6: memref<1x4x256xf32, #tpu.memory_space<vmem>>) attributes {dimension_semantics = [#tpu.dimension_semantics<parallel>, #tpu.dimension_semantics<parallel>, #tpu.dimension_semantics<parallel>], iteration_bounds = array<i64: 2, 1, 1>, scalar_prefetch = 0 : i64, scratch_operands = 0 : i64, tpu.core_type = #tpu.core_type<tc>, window_params = [{transform_indices = @transform_0, window_bounds = array<i64: 1, 4, 1>}, {transform_indices = @transform_1, window_bounds = array<i64: 1, 4, 1>}, {transform_indices = @transform_2, window_bounds = array<i64: 1, 4, 256>}, {transform_indices = @transform_3, window_bounds = array<i64: 1, 4, 256>}]} {
    %c0 = arith.constant 0 : index
    %c0_0 = arith.constant 0 : index
    %c0_1 = arith.constant 0 : index
    %0 = vector.load %arg5[%c0, %c0_0, %c0_1] : memref<1x4x256xf32, #tpu.memory_space<vmem>>, vector<1x4x256xf32>
    %1 = vector.shape_cast %0 : vector<1x4x256xf32> to vector<4x256xf32>
    %c0_2 = arith.constant 0 : index
    %c0_3 = arith.constant 0 : index
    %c0_4 = arith.constant 0 : index
    %2 = vector.load %arg3[%c0_2, %c0_3, %c0_4] : memref<1x4x1xf32, #tpu.memory_space<vmem>>, vector<1x4x1xf32>
    %3 = vector.shape_cast %2 : vector<1x4x1xf32> to vector<4x1xf32>
    %cst = arith.constant 1.000000e+00 : f32
    %4 = vector.broadcast %cst : f32 to vector<4x1xf32>
    %5 = arith.addf %3, %4 : vector<4x1xf32>
    %6 = vector.broadcast %5 : vector<4x1xf32> to vector<4x256xf32>
    %7 = arith.mulf %1, %6 : vector<4x256xf32>
    %c0_5 = arith.constant 0 : index
    %c0_6 = arith.constant 0 : index
    %c0_7 = arith.constant 0 : index
    %8 = vector.load %arg4[%c0_5, %c0_6, %c0_7] : memref<1x4x1xf32, #tpu.memory_space<vmem>>, vector<1x4x1xf32>
    %9 = vector.shape_cast %8 : vector<1x4x1xf32> to vector<4x1xf32>
    %10 = vector.broadcast %9 : vector<4x1xf32> to vector<4x256xf32>
    %11 = arith.addf %7, %10 : vector<4x256xf32>
    %c0_8 = arith.constant 0 : index
    %c0_9 = arith.constant 0 : index
    %c0_10 = arith.constant 0 : index
    %12 = vector.load %arg6[%c0_8, %c0_9, %c0_10] : memref<1x4x256xf32, #tpu.memory_space<vmem>>, vector<1x4x256xf32>
    %13 = vector.shape_cast %12 : vector<1x4x256xf32> to vector<4x256xf32>
    %14 = vector.shape_cast %11 : vector<4x256xf32> to vector<1x4x256xf32>
    tpu.vector_store %arg6[%c0_8, %c0_9, %c0_10], %14 {strides = array<i32>} : memref<1x4x256xf32, #tpu.memory_space<vmem>>, vector<1x4x256xf32>,
    return
  }
  func.func @transform_0(%arg0: i32, %arg1: i32, %arg2: i32) -> (i32, i32, i32) {
    %c0_i32 = arith.constant 0 : i32
    %c0_i32_0 = arith.constant 0 : i32
    return %arg0, %arg1, %c0_i32 : i32, i32, i32
  }
  func.func @transform_1(%arg0: i32, %arg1: i32, %arg2: i32) -> (i32, i32, i32) {
    %c0_i32 = arith.constant 0 : i32
    %c0_i32_0 = arith.constant 0 : i32
    return %arg0, %arg1, %c0_i32 : i32, i32, i32
  }
  func.func @transform_2(%arg0: i32, %arg1: i32, %arg2: i32) -> (i32, i32, i32) {
    %c0_i32 = arith.constant 0 : i32
    return %arg0, %arg1, %arg2 : i32, i32, i32
  }
  func.func @transform_3(%arg0: i32, %arg1: i32, %arg2: i32) -> (i32, i32, i32) {
    %c0_i32 = arith.constant 0 : i32
    return %arg0, %arg1, %arg2 : i32, i32, i32
  }
}

</mosaic_0001>

<bundles_post_ra>
// kernel: style_mod.2
= control target key start
LH: loop header
LB: loop body
LE: loop exit
PB: predicated region body
PF: predicated region fallthrough
CT: control target
= control target key end

     0   :  { %v126_v0 = vmov 0.0   ;;  %vm127_vm0 = vmmov 0   ;;  %vm26_vm1 = vcmask 261120   ;;  %vm100_vm2 = vcmask 58368   ;;  %s169_s1 = inlined_call_operand.vmem [shape: f32[32,8], index: 1, kind: input, shape index: {}]   ;;  %s170_s0 = inlined_call_operand.vmem [shape: f32[2,32], index: 0, kind: input, shape index: {}]   ;;  %s171_s2 = inlined_call_operand.vmem [shape: f32[1,8], index: 2, kind: input, shape index: {}]   ;;  %s172_s3 = inlined_call_operand.vmem [shape: f32[2,8], index: 3, kind: output, shape index: {}]  }
   0x1   :  { %113 = vmatprep.subr.mxu0 %v126_v0  ;;  %v18_v1 = vld [vmem:[%s169_s1 + $0x18] sm:$0xff]  ;;  %v17_v2 = vld [vmem:[%s169_s1 + $0x10] sm:$0xff]  ;;  %121 = vmatprep.mubr.msk.f32.mxu0 %vm127_vm0, %v126_v0  ;;  %v16_v3 = vld [vmem:[%s169_s1 + $0x8] sm:$0xff] }
   0x2   :  { %114 = vmatpush3.msra.mxu0 %v18_v1  ;;  %v15_v4 = vld [vmem:[%s169_s1] sm:$0xff] }
   0x3   :  { %115 = vmatprep.subr.mxu0 %v126_v0  ;;  %v14_v5 = vld [vmem:[%s170_s0] sm:$0x3] }
   0x4   :  { %116 = vmatpush3.msra.mxu0 %v17_v2  ;;  %v106_v6 = vld [vmem:[%s171_s2] ss:$0 sm:$0xff] }
   0x5   :  { %117 = vmatprep.subr.mxu0 %v126_v0 }
   0x6   :  { %118 = vmatpush3.msra.mxu0 %v16_v3 }
   0x7   :  { %119 = vmatprep.subr.mxu0 %v126_v0 }
   0x8   :  { %120 = vmatpush3.msra.mxu0 %v15_v4 }
   0x9   :  { %122 = vmatmul.mubr.msk.f32.vlgmr.msra.gmra.mxu0 %vm26_vm1, %v14_v5 }
  0xc9   :  { %v96_v7 = vpop.f32.mrf.mxu0 }
  0xca   :  { %v97_v8 = vadd.f32 %v106_v6, %v96_v7 }
  0xcb   :  { %v123_v9 = vpop.f32.mrf.mxu0 }
  0xcc   :  { %101 = vst.msk [vmem:[%s172_s3] sm:$0x3] %vm100_vm2, %v97_v8 }

// kernel: style_mod.3
= control target key start
LH: loop header
LB: loop body
LE: loop exit
PB: predicated region body
PF: predicated region fallthrough
CT: control target
= control target key end

     0   :  { %s558_s12 = smov 0   ;;  %s560_s13 = smov 0   ;;  %s597_s0 = inlined_call_operand.vmem [shape: f32[2,4,1], index: 0, kind: input, shape index: {}]   ;;  %s598_s1 = inlined_call_operand.vmem [shape: f32[2,4,1], index: 1, kind: input, shape index: {}]   ;;  %s599_s2 = inlined_call_operand.vmem [shape: f32[2,4,256], index: 2, kind: input, shape index: {}]   ;;  %s600_s3 = inlined_call_operand.vmem [shape: f32[2,4,256], index: 3, kind: output, shape index: {}]  }
   0x1   :  { %s562_s14 = smov 0  }
   0x2 LB: > { %s32_s15 = sadd.s32 1, %s530_s13  ;;  %p474_p0 = scmp.ge.s32.totalorder %s534_s14, 1  ;;  %s534_s14 = sphi %s562_s14, %s13_s14   ;;  %s530_s13 = sphi %s560_s13, %s602_s13   ;;  %s526_s12 = sphi %s558_s12, %s601_s12  }
   0x3   : > { %p34_p1 = scmp.ge.s32.totalorder %s32_s15, 2  ;;  %p201_p2 = scmp.lt.s32.totalorder %s534_s14, 3 }
   0x5   : > { %s604_s15 = smov (%p34_p1, %s32_s15), 0  ;;  %p202_p3 = pnand %p474_p0, %p201_p2 }
   0x6   : > { %p255_p4 = scmp.lt.s32.totalorder (!%p202_p3), %s526_s12, 1 }
   0x7   : > { %205 = sbr.rel (%p202_p3) target bundleno = 151 (0x97), region = 32 }
   0xc   : > { %v536_v0 = vmov 0   ;;  %s606_s12 = smov (!%p255_p4, %s526_s12), 1  ;;  %v537_v4 = vmov 839922192   ;;  %v307_v6 = vlaneseq }
   0xd   : > { %511 = vset.pattern.permute.xlu0 %v536_v0  ;;  %s475_s16 = sshll.u32 %s606_s12, 2  ;;  %v305_v5 = vunpack.c.l.s4 %v537_v4  ;;  %s483_s23 = sshll.u32 %s606_s12, 3 }
   0xe   : > { %s261_s19 = scalar_lea.vmem %s597_s0, %s475_s16  ;;  %s268_s22 = scalar_lea.vmem %s598_s1, %s475_s16  ;;  %v308_v8 = vshrl.u32 %v307_v6, 7 }
   0xf   : > { %v298_v1 = vld [vmem:[%s261_s19] sm:$0xf]  ;;  %v306_v7 = vunpack.c.0.s8 %v305_v5  ;;  %s281_s26 = scalar_lea.vmem %s599_s2, %s483_s23  ;;  %s295_s29 = scalar_lea.vmem %s600_s3, %s483_s23 }
  0x10   : > { %v299_v2 = vadd.f32 1.0, %v298_v1  ;;  %v313_v3 = vld [vmem:[%s268_s22] sm:$0xf] }
  0x11   : > { %v309_v9 = vsub.s32 %v306_v7, %v308_v8  ;;  %v297_v12 = vld [vmem:[%s281_s26] sm:$0xff] }
  0x12   : > { %302 = vperm.xlu0 %511, %v299_v2  }
  0x16   : > { %316 = vperm.xlu0 %511, %v313_v3  }
  0x8d   : > { %v303_v10 = vpop.permute.xlu0 %302 }
  0x8e   : > { %v310_v11 = vrot.slane %v303_v10, %v309_v9 }
  0x90   : > { %v312_v14 = vmul.f32 %v310_v11, %v297_v12 }
  0x91   : > { %v317_v13 = vpop.permute.xlu0 %316 }
  0x92   : > { %v324_v15 = vrot.slane %v317_v13, %v309_v9 }
  0x94   : > { %v326_v16 = vadd.f32 %v324_v15, %v312_v14 }
  0x96   : > { %327 = vst [vmem:[%s295_s29] sm:$0xff] %v326_v16 }
  0x97 PF: > { %s13_s14 = sadd.s32 1, %s534_s14   ;;  %s601_s12 = smov %s530_s13 }
  0x98   : > { %p10_p5 = scmp.ge.s32.totalorder %s13_s14, 4   ;;  %s602_s13 = smov %s604_s15 }
  0x9a   :  { %12 = sbr.rel (!%p10_p5) target bundleno = 2 (0x2), region = 68 }

</bundles_post_ra>
